<compile_context>
chip_gen: v6e
topology: v6e:2x2x1
jax: 0.10.0
libtpu: 0.0.40
codegen_flags: <defaults>
</compile_context>

<pallas_src>
import math

import jax
import jax.numpy as jnp
from jax.experimental import pallas as pl
from jax.experimental.pallas import tpu as pltpu


def _round_up(n: int, m: int) -> int:
    return ((n + m - 1) // m) * m


def velo_decoder_kernel(x_ref, w3_ref, b3_ref, w2_ref, b2_ref, w1_ref, b1_ref,
                        o_ref):
    x = x_ref[...]                                        # (2, tb) f32
    # Layer e3 (K=2): VPU broadcast-FMAs, not a tiny MXU matmul.
    h = (w3_ref[:, 0:1] * x[0:1, :]
         + w3_ref[:, 1:2] * x[1:2, :]
         + b3_ref[...])                                   # (10, tb)
    h = jnp.maximum(h, 0.0)
    # Layer e2: (40, 10) @ (10, tb) + (40, 1), ReLU  (MXU, f32 accumulate)
    h = jnp.dot(w2_ref[...], h, preferred_element_type=jnp.float32) + b2_ref[...]
    h = jnp.maximum(h, 0.0)
    # Layer e1: (out, 40) @ (40, tb) + (out, 1)
    o = jnp.dot(w1_ref[...], h, preferred_element_type=jnp.float32) + b1_ref[...]
    o_ref[...] = o.astype(o_ref.dtype)


def velo_decoder(x, params, *, batch_tile=None, out_dtype=jnp.float32):
    """x: (B, 2) float32; params: PyTorch-layout weights (out, in), biases (out, 1)."""
    B, in_dim = x.shape
    w3, b3 = params["w3"], params["b3"]   # (10, 2),   (10, 1)
    w2, b2 = params["w2"], params["b2"]   # (40, 10),  (40, 1)
    w1, b1 = params["w1"], params["b1"]   # (out, 40), (out, 1)
    out_dim = w1.shape[0]

    if batch_tile is None:
        # Lane-dense tiles: multiples of 128.  Big enough to amortize the
        # ~0.35us/step pipeline overhead, >=2 steps when the batch allows
        # (megacore), capped so double-buffered VMEM stays well under limits.
        padded = _round_up(B, 128)
        batch_tile = min(2048, max(128, (padded // 2) // 128 * 128))
    assert batch_tile % 128 == 0, "batch_tile must be a multiple of 128"

    B_pad = _round_up(B, batch_tile)
    # Feature-major: pad the batch and put it on the 128-lane axis.
    x_t = jnp.pad(x, ((0, B_pad - B), (0, 0))).T          # (2, B_pad)

    grid = (B_pad // batch_tile,)

    def resident(shape):
        # Whole tiny array, constant index map -> stays VMEM-resident.
        return pl.BlockSpec(shape, lambda i: (0, 0))

    flops = 2 * B_pad * (2 * 10 + 10 * 40 + 40 * out_dim)
    weight_bytes = sum(int(a.size) * a.dtype.itemsize
                       for a in (w3, b3, w2, b2, w1, b1))
    bytes_accessed = (B_pad * in_dim * 4
                      + B_pad * out_dim * jnp.dtype(out_dtype).itemsize
                      + weight_bytes)

    out_t = pl.pallas_call(
        velo_decoder_kernel,
        out_shape=jax.ShapeDtypeStruct((out_dim, B_pad), out_dtype),
        grid_spec=pltpu.PrefetchScalarGridSpec(
            num_scalar_prefetch=0,
            grid=grid,
            in_specs=[
                pl.BlockSpec((in_dim, batch_tile), lambda i: (0, i)),
                resident(w3.shape), resident(b3.shape),
                resident(w2.shape), resident(b2.shape),
                resident(w1.shape), resident(b1.shape),
            ],
            out_specs=pl.BlockSpec((out_dim, batch_tile), lambda i: (0, i)),
        ),
        compiler_params=pltpu.CompilerParams(
            dimension_semantics=("parallel",)),
        cost_estimate=pl.CostEstimate(
            flops=int(flops),
            transcendentals=0,
            bytes_accessed=int(bytes_accessed)),
    )(x_t, w3, b3, w2, b2, w1, b1)

    # (out, B_pad) -> (B, out); drop the padded rows.
    return out_t.T[:B]


def init_params(key, output_size):
    """nn.Linear-style U(-1/sqrt(fan_in), 1/sqrt(fan_in)) init, PyTorch layout:
    weights (out, in), biases (out, 1)."""
    dims = [(2, 10, "3"), (10, 40, "2"), (40, output_size, "1")]
    params = {}
    for fan_in, fan_out, tag in dims:
        key, kw, kb = jax.random.split(key, 3)
        bound = 1.0 / math.sqrt(fan_in)
        params[f"w{tag}"] = jax.random.uniform(
            kw, (fan_out, fan_in), jnp.float32, -bound, bound)
        params[f"b{tag}"] = jax.random.uniform(
            kb, (fan_out, 1), jnp.float32, -bound, bound)
    return params


def velo_decoder_ref(x, params):
    h = jnp.maximum(x @ params["w3"].T + params["b3"].T, 0.0)
    h = jnp.maximum(h @ params["w2"].T + params["b2"].T, 0.0)
    return h @ params["w1"].T + params["b1"].T


if __name__ == "__main__":
    key = jax.random.PRNGKey(0)
    key, kx = jax.random.split(key)

    output_size = 32
    batch = 200   # not a multiple of 128 -> exercises padding + a 2-step grid
    x = jax.random.normal(kx, (batch, 2), jnp.float32)

    params = init_params(key, output_size)

    out = jax.block_until_ready(velo_decoder(x, params))
    ref = velo_decoder_ref(x, params)

    assert out.shape == (batch, output_size), out.shape
    assert jnp.allclose(out, ref, atol=1e-5, rtol=1e-5), "mismatch vs reference"

    print("KERNEL_OK")
</pallas_src>

<mosaic_0001>
module attributes {stable_mosaic.version = 11 : i64} {
  func.func @velo_decoder_kernel(%arg0: i32, %arg1: memref<2x128xf32, #tpu.memory_space<vmem>>, %arg2: memref<10x2xf32, #tpu.memory_space<vmem>>, %arg3: memref<10x1xf32, #tpu.memory_space<vmem>>, %arg4: memref<40x10xf32, #tpu.memory_space<vmem>>, %arg5: memref<40x1xf32, #tpu.memory_space<vmem>>, %arg6: memref<32x40xf32, #tpu.memory_space<vmem>>, %arg7: memref<32x1xf32, #tpu.memory_space<vmem>>, %arg8: memref<32x128xf32, #tpu.memory_space<vmem>>) attributes {dimension_semantics = [#tpu.dimension_semantics<parallel>], iteration_bounds = array<i64: 2>, scalar_prefetch = 0 : i64, scratch_operands = 0 : i64, tpu.core_type = #tpu.core_type<tc>, window_params = [{transform_indices = @transform_0, window_bounds = array<i64: 2, 128>}, {pipeline_mode = #tpu.pipeline_mode<synchronous>, transform_indices = @transform_1, window_bounds = array<i64: 10, 2>}, {pipeline_mode = #tpu.pipeline_mode<synchronous>, transform_indices = @transform_2, window_bounds = array<i64: 10, 1>}, {pipeline_mode = #tpu.pipeline_mode<synchronous>, transform_indices = @transform_3, window_bounds = array<i64: 40, 10>}, {pipeline_mode = #tpu.pipeline_mode<synchronous>, transform_indices = @transform_4, window_bounds = array<i64: 40, 1>}, {pipeline_mode = #tpu.pipeline_mode<synchronous>, transform_indices = @transform_5, window_bounds = array<i64: 32, 40>}, {pipeline_mode = #tpu.pipeline_mode<synchronous>, transform_indices = @transform_6, window_bounds = array<i64: 32, 1>}, {transform_indices = @transform_7, window_bounds = array<i64: 32, 128>}]} {
    %c0 = arith.constant 0 : index
    %c0_0 = arith.constant 0 : index
    %0 = vector.load %arg1[%c0, %c0_0] : memref<2x128xf32, #tpu.memory_space<vmem>>, vector<2x128xf32>
    %c0_1 = arith.constant 0 : index
    %c0_2 = arith.constant 0 : index
    %1 = vector.load %arg2[%c0_1, %c0_2] : memref<10x2xf32, #tpu.memory_space<vmem>>, vector<10x1xf32>
    %2 = vector.extract_strided_slice %0 {offsets = [0, 0], sizes = [1, 128], strides = [1, 1]} : vector<2x128xf32> to vector<1x128xf32>
    %3 = vector.broadcast %1 : vector<10x1xf32> to vector<10x128xf32>
    %4 = vector.broadcast %2 : vector<1x128xf32> to vector<10x128xf32>
    %5 = arith.mulf %3, %4 : vector<10x128xf32>
    %c0_3 = arith.constant 0 : index
    %c1 = arith.constant 1 : index
    %6 = vector.load %arg2[%c0_3, %c1] : memref<10x2xf32, #tpu.memory_space<vmem>>, vector<10x1xf32>
    %7 = vector.extract_strided_slice %0 {offsets = [1, 0], sizes = [1, 128], strides = [1, 1]} : vector<2x128xf32> to vector<1x128xf32>
    %8 = vector.broadcast %6 : vector<10x1xf32> to vector<10x128xf32>
    %9 = vector.broadcast %7 : vector<1x128xf32> to vector<10x128xf32>
    %10 = arith.mulf %8, %9 : vector<10x128xf32>
    %11 = arith.addf %5, %10 : vector<10x128xf32>
    %c0_4 = arith.constant 0 : index
    %c0_5 = arith.constant 0 : index
    %12 = vector.load %arg3[%c0_4, %c0_5] : memref<10x1xf32, #tpu.memory_space<vmem>>, vector<10x1xf32>
    %13 = vector.broadcast %12 : vector<10x1xf32> to vector<10x128xf32>
    %14 = arith.addf %11, %13 : vector<10x128xf32>
    %cst = arith.constant 0.000000e+00 : f32
    %15 = vector.broadcast %cst : f32 to vector<10x128xf32>
    %16 = arith.maximumf %14, %15 : vector<10x128xf32>
    %c0_6 = arith.constant 0 : index
    %c0_7 = arith.constant 0 : index
    %17 = vector.load %arg4[%c0_6, %c0_7] : memref<40x10xf32, #tpu.memory_space<vmem>>, vector<40x10xf32>
    %cst_8 = arith.constant dense<0.000000e+00> : vector<40x128xf32>
    %18 = tpu.matmul %17, %16, %cst_8 {dimension_numbers = #tpu.dot_dimension_numbers<[1], [0], [0], [1], [0, 0, 1, 1], [], []>} : vector<40x10xf32>, vector<10x128xf32>, vector<40x128xf32> -> vector<40x128xf32>
    %c0_9 = arith.constant 0 : index
    %c0_10 = arith.constant 0 : index
    %19 = vector.load %arg5[%c0_9, %c0_10] : memref<40x1xf32, #tpu.memory_space<vmem>>, vector<40x1xf32>
    %20 = vector.broadcast %19 : vector<40x1xf32> to vector<40x128xf32>
    %21 = arith.addf %18, %20 : vector<40x128xf32>
    %cst_11 = arith.constant 0.000000e+00 : f32
    %22 = vector.broadcast %cst_11 : f32 to vector<40x128xf32>
    %23 = arith.maximumf %21, %22 : vector<40x128xf32>
    %c0_12 = arith.constant 0 : index
    %c0_13 = arith.constant 0 : index
    %24 = vector.load %arg6[%c0_12, %c0_13] : memref<32x40xf32, #tpu.memory_space<vmem>>, vector<32x40xf32>
    %cst_14 = arith.constant dense<0.000000e+00> : vector<32x128xf32>
    %25 = tpu.matmul %24, %23, %cst_14 {dimension_numbers = #tpu.dot_dimension_numbers<[1], [0], [0], [1], [0, 0, 1, 1], [], []>} : vector<32x40xf32>, vector<40x128xf32>, vector<32x128xf32> -> vector<32x128xf32>
    %c0_15 = arith.constant 0 : index
    %c0_16 = arith.constant 0 : index
    %26 = vector.load %arg7[%c0_15, %c0_16] : memref<32x1xf32, #tpu.memory_space<vmem>>, vector<32x1xf32>
    %27 = vector.broadcast %26 : vector<32x1xf32> to vector<32x128xf32>
    %28 = arith.addf %25, %27 : vector<32x128xf32>
    %c0_17 = arith.constant 0 : index
    %c0_18 = arith.constant 0 : index
    %29 = vector.load %arg8[%c0_17, %c0_18] : memref<32x128xf32, #tpu.memory_space<vmem>>, vector<32x128xf32>
    tpu.vector_store %arg8[%c0_17, %c0_18], %28 {strides = array<i32>} : memref<32x128xf32, #tpu.memory_space<vmem>>, vector<32x128xf32>,
    return
  }
  func.func @transform_0(%arg0: i32) -> (i32, i32) {
    %c0_i32 = arith.constant 0 : i32
    %c0_i32_0 = arith.constant 0 : i32
    return %c0_i32, %arg0 : i32, i32
  }
  func.func @transform_1(%arg0: i32) -> (i32, i32) {
    %c0_i32 = arith.constant 0 : i32
    %c0_i32_0 = arith.constant 0 : i32
    %c0_i32_1 = arith.constant 0 : i32
    return %c0_i32, %c0_i32_0 : i32, i32
  }
  func.func @transform_2(%arg0: i32) -> (i32, i32) {
    %c0_i32 = arith.constant 0 : i32
    %c0_i32_0 = arith.constant 0 : i32
    %c0_i32_1 = arith.constant 0 : i32
    return %c0_i32, %c0_i32_0 : i32, i32
  }
  func.func @transform_3(%arg0: i32) -> (i32, i32) {
    %c0_i32 = arith.constant 0 : i32
    %c0_i32_0 = arith.constant 0 : i32
    %c0_i32_1 = arith.constant 0 : i32
    return %c0_i32, %c0_i32_0 : i32, i32
  }
  func.func @transform_4(%arg0: i32) -> (i32, i32) {
    %c0_i32 = arith.constant 0 : i32
    %c0_i32_0 = arith.constant 0 : i32
    %c0_i32_1 = arith.constant 0 : i32
    return %c0_i32, %c0_i32_0 : i32, i32
  }
  func.func @transform_5(%arg0: i32) -> (i32, i32) {
    %c0_i32 = arith.constant 0 : i32
    %c0_i32_0 = arith.constant 0 : i32
    %c0_i32_1 = arith.constant 0 : i32
    return %c0_i32, %c0_i32_0 : i32, i32
  }
  func.func @transform_6(%arg0: i32) -> (i32, i32) {
    %c0_i32 = arith.constant 0 : i32
    %c0_i32_0 = arith.constant 0 : i32
    %c0_i32_1 = arith.constant 0 : i32
    return %c0_i32, %c0_i32_0 : i32, i32
  }
  func.func @transform_7(%arg0: i32) -> (i32, i32) {
    %c0_i32 = arith.constant 0 : i32
    %c0_i32_0 = arith.constant 0 : i32
    return %c0_i32, %arg0 : i32, i32
  }
}

</mosaic_0001>

<bundles_post_ra>
// kernel: tpu_custom_call.1
= control target key start
LH: loop header
LB: loop body
LE: loop exit
PB: predicated region body
PF: predicated region fallthrough
CT: control target
= control target key end

     0   :  { %12 = vsyncpa [#allocation3], 0  ;;  %s1097_s0 = inlined_call_operand.vmem [shape: f32[2,256], index: 0, kind: input, shape index: {}]   ;;  %s1098_s1 = inlined_call_operand.vmem [shape: f32[10,2], index: 1, kind: input, shape index: {}]   ;;  %s1099_s2 = inlined_call_operand.vmem [shape: f32[10,1], index: 2, kind: input, shape index: {}]   ;;  %s1100_s3 = inlined_call_operand.vmem [shape: f32[40,10], index: 3, kind: input, shape index: {}]   ;;  %s1101_s4 = inlined_call_operand.vmem [shape: f32[40,1], index: 4, kind: input, shape index: {}]   ;;  %s1102_s5 = inlined_call_operand.vmem [shape: f32[32,40], index: 5, kind: input, shape index: {}]   ;;  %s1103_s6 = inlined_call_operand.vmem [shape: f32[32,1], index: 6, kind: input, shape index: {}]   ;;  %s1104_s7 = inlined_call_operand.hbm [shape: f32[32,256], index: 7, kind: output, shape index: {}]  }
   0x1   :  { %14 = vsyncpa [#allocation3 + $0x1], 0  ;;  %s913_s24 = smov 0   ;;  %s915_s25 = smov 0  }
   0x2   :  { %s917_s26 = smov 0   ;;  %s919_s27 = smov 0  }
   0x3 LB: > { %s934_s28 = sadd.s32 4294967295, %s863_s27   ;;  %s680_s29 = sadd.s32 4294967294, %s863_s27   ;;  %s863_s27 = sphi %s919_s27, %s1110_s27   ;;  %s859_s26 = sphi %s917_s26, %s1109_s26   ;;  %s855_s25 = sphi %s915_s25, %s1108_s25   ;;  %s851_s24 = sphi %s913_s24, %s1107_s24  }
   0x4   : > { %s938_s30 = sadd.s32 1, %s863_s27   ;;  %s179_s8 = sadd.s32 1, %s859_s26 }
   0x5   : > { %s176_s9 = ssub.s32 %s863_s27, %s938_s30  ;;  %p189_p0 = scmp.ne.s32.totalorder %s859_s26, %s855_s25 }
   0x6   : > { %p177_p1 = scmp.eq.s32.totalorder %s176_s9, 0  ;;  %p190_p2 = scmp.eq.s32.totalorder %s934_s28, 1 }
   0x7   : > { %p195_p3 = scmp.ne.s32.totalorder %s855_s25, %s851_s24  ;;  %p196_p4 = scmp.eq.s32.totalorder %s680_s29, 1 }
   0x8   : > { %s949_s10 = scalar_select %p177_p1, %s859_s26, %s179_s8  }
   0x9   : > { %p951_p5 = por %p190_p2, %p189_p0  ;;  %p955_p6 = por %p196_p4, %p195_p3 }
   0xa   : > { %p683_p7 = scmp.ge.s32.totalorder %s863_s27, 1  ;;  %p239_p8 = scmp.lt.s32.totalorder %s863_s27, 3 }
   0xc   : > { %p240_p9 = pnand %p683_p7, %p239_p8 }
   0xd   : > { %p270_p10 = scmp.lt.s32.totalorder (!%p240_p9), %s934_s28, 1  ;;  %s267_s20 = sand.u32 (!%p240_p9), 1, %s855_s25  }
   0xe   : > { %243 = sbr.rel (%p240_p9) target bundleno = 601 (0x259), region = 48  ;;  %s684_s21 = sshll.u32 (!%p240_p9), %s267_s20, 5 }
   0xf   : > { %s269_s22 = scalar_lea.vmem (!%p240_p9), [#allocation2], %s684_s21  ;;  %s697_s29 = sshll.u32 (!%p240_p9), %s934_s28, 7 }
  0x10   : > { %s618_s23 = sshll.u32 (!%p240_p9), %s269_s22, 4  ;;  %s1055_s13 = scalar_lea.hbm (!%p240_p9), %s1104_s7, %s697_s29  ;;  %s1050_s23 = int_to_ptr.vmem [resolvable:$true] %s618_s23 }
  0x11   : > { %s803_s14 = scalar_lea.vmem (!%p240_p9), %s1050_s23, 512 }
  0x12   : > { %p804_p11 = scmp.ne.s32.totalorder (!%p240_p9), %s1050_s23, %s803_s14 }
  0x13   : > { %v276_v0 = vld [vmem:[%s1098_s1 + $0x8] sm:$0x3]  ;;  %v275_v1 = vld [vmem:[%s1098_s1] sm:$0xff]  ;;  %v865_v2 = vmov 0   ;;  %v866_v3 = vmov 1   ;;  %v332_v6 = vld [vmem:[%s1101_s4 + $0x10] sm:$0xff]  ;;  %v287_v16 = vlaneseq }
  0x14   : > { %799 = vset.pattern.permute.xlu1 %v865_v2  ;;  %797 = vset.pattern.permute.xlu0 %v865_v2  ;;  %v309_v4 = vld [vmem:[%s1099_s2] sm:$0xff]  ;;  %v310_v5 = vld [vmem:[%s1099_s2 + $0x8] sm:$0x3]  ;;  %v867_v8 = vmov 0.0   ;;  %vm868_vm0 = vmmov 0   ;;  %v333_v10 = vld [vmem:[%s1101_s4 + $0x18] sm:$0xff]  ;;  %p805_p12 = pnand %p804_p11, %p951_p5 }
  0x15   : > { %284 = vperm.xlu0 %797, %v276_v0   ;;  %279 = vperm.xlu1 %799, %v275_v1   ;;  %v334_v7 = vld [vmem:[%s1101_s4 + $0x20] sm:$0xff]  ;;  %v480_v11 = vld [vmem:[%s1103_s6 + $0x8] sm:$0xff]  ;;  %v482_v13 = vld [vmem:[%s1103_s6 + $0x18] sm:$0xff]  ;;  %s271_s8 = scalar_select %p270_p10, %s934_s28, 1  ;;  %v288_v17 = vshrl.u32 %v287_v16, 7  ;;  %vm376_vm1 = vcmask 1041408  }
  0x16   : > { %716 = vmatprep.subr.mxu0 %v867_v8  ;;  %720 = vmatprep.mubr.msk.f32.mxu0 %vm868_vm0, %v867_v8  ;;  %v330_v9 = vld [vmem:[%s1101_s4] sm:$0xff]  ;;  %v331_v12 = vld [vmem:[%s1101_s4 + $0x8] sm:$0xff]  ;;  %v481_v15 = vld [vmem:[%s1103_s6 + $0x10] sm:$0xff]  ;;  %vm360_vm2 = vcmask 80896   ;;  %vm503_vm3 = vcmask 326656   ;;  %s1057_s28 = scalar_lea.sflag [#allocation3], %s267_s20  ;;  %p806_p13 = pneg %p805_p12 }
  0x17   : > { %v479_v14 = vld [vmem:[%s1103_s6] sm:$0xff]  ;;  %s685_s9 = sshll.u32 %s271_s8, 1  ;;  %v289_v18 = vsub.s32 0, %v288_v17  ;;  %v303_v19 = vsub.s32 1, %v288_v17  ;;  %v326_v40 = vld [vmem:[%s1100_s3 + $0x8] sm:$0xff]  ;;  %v327_v41 = vld [vmem:[%s1100_s3 + $0x10] sm:$0xff] }
  0x18   : > { %s273_s15 = scalar_lea.vmem %s1097_s0, %s685_s9  ;;  %v325_v39 = vld [vmem:[%s1100_s3] sm:$0xff]  ;;  %v328_v42 = vld [vmem:[%s1100_s3 + $0x18] sm:$0xff] }
  0x19   : > { %798 = vset.pattern.permute.xlu0 %v866_v3  ;;  %800 = vset.pattern.permute.xlu1 %v866_v3  ;;  %v274_v20 = vld [vmem:[%s273_s15] sm:$0x3]  ;;  %s869_s15 = smov [#allocation2]  }
  0x1a   : > { %298 = vperm.xlu0 %798, %v276_v0   ;;  %294 = vperm.xlu1 %800, %v275_v1   ;;  %v290_v23 = vrot.slane %v274_v20, %v289_v18  ;;  %v304_v24 = vrot.slane %v274_v20, %v303_v19  ;;  %v329_v43 = vld [vmem:[%s1100_s3 + $0x20] sm:$0xff]  ;;  %s807_s16 = sshll.u32 %s869_s15, 4  ;;  %s808_s16 = int_to_ptr.vmem [resolvable:$false] %s807_s16 }
  0x1b   : > { %v475_v44 = vld [vmem:[%s1102_s5] sm:$0xff]  ;;  %s809_s17 = scalar_lea.vmem %s808_s16, 1024  ;;  %p810_p0 = scmp.lt.s32.totalorder %s1050_s23, %s808_s16 }
  0x1c   : > { %745 = vmatprep.mubr.msk.f32.mxu1 %vm503_vm3, %v475_v44  ;;  %p811_p1 = scmp.lt.s32.totalorder %s809_s17, %s803_s14 }
  0x1e   : > { %802 = vset.pattern.permute.xlu0 %v865_v2  ;;  %801 = vset.pattern.permute.xlu1 %v865_v2  ;;  %p812_p2 = por %p811_p1, %p810_p0 }
  0x1f   : > { %313 = vperm.xlu0 %802, %v309_v4   ;;  %318 = vperm.xlu1 %801, %v310_v5  }
  0x20   : > { %p813_p3 = pnand %p812_p2, %p806_p13 }
  0x23   : > { %347 = vperm.xlu0 %802, %v332_v6   ;;  %357 = vperm.xlu1 %801, %v334_v7   ;;  %v476_v6 = vld [vmem:[%s1102_s5 + $0x8] sm:$0xff]  ;;  %v477_v7 = vld [vmem:[%s1102_s5 + $0x10] sm:$0xff] }
  0x27   : > { %337 = vperm.xlu0 %802, %v330_v9   ;;  %352 = vperm.xlu1 %801, %v333_v10  }
  0x2b   : > { %490 = vperm.xlu0 %802, %v480_v11   ;;  %342 = vperm.xlu1 %801, %v331_v12  }
  0x2f   : > { %500 = vperm.xlu0 %802, %v482_v13   ;;  %485 = vperm.xlu1 %801, %v479_v14  }
  0x33   : > { %495 = vperm.xlu1 %801, %v481_v15  }
  0x90   : > { %v280_v21 = vpop.permute.xlu1 %279  ;;  %v285_v22 = vpop.permute.xlu0 %284 }
  0x91   : > { %v291_v27 = vmul.f32 %v290_v23, %v280_v21  ;;  %v292_v28 = vmul.f32 %v290_v23, %v285_v22 }
  0x95   : > { %v299_v25 = vpop.permute.xlu0 %298  ;;  %v295_v26 = vpop.permute.xlu1 %294 }
  0x96   : > { %v306_v29 = vmul.f32 %v304_v24, %v299_v25  ;;  %v305_v30 = vmul.f32 %v304_v24, %v295_v26 }
  0x98   : > { %v307_v31 = vadd.f32 %v305_v30, %v291_v27  ;;  %v308_v32 = vadd.f32 %v306_v29, %v292_v28 }
  0x9a   : > { %v314_v33 = vpop.permute.xlu0 %313  ;;  %v319_v34 = vpop.permute.xlu1 %318 }
  0x9b   : > { %v321_v35 = vadd.f32 %v314_v33, %v307_v31  ;;  %v322_v36 = vadd.f32 %v319_v34, %v308_v32 }
  0x9d   : > { %v324_v37 = vmax.f32 %v322_v36, 0.0  ;;  %v323_v38 = vmax.f32 %v321_v35, 0.0 }
  0x9e   : > { %v358_v49 = vpop.permute.xlu1 %357  ;;  %v348_v55 = vpop.permute.xlu0 %347 }
  0x9f   : > { %717 = vmatpush3.msk.msra.mxu0 %vm376_vm1, %v324_v37 }
  0xa0   : > { %718 = vmatprep.subr.mxu0 %v867_v8 }
  0xa1   : > { %719 = vmatpush3.msra.mxu0 %v323_v38 }
  0xa2   : > { %721 = vmatmul.mubr.msk.f32.vlgmr.msra.gmra.mxu0 %vm360_vm2, %v325_v39  ;;  %v353_v53 = vpop.permute.xlu1 %352  ;;  %v338_v1 = vpop.permute.xlu0 %337 }
  0xa3   : > { %723 = vmatprep.mubr.msk.f32.mxu0 %vm868_vm0, %v867_v8 }
  0xa6   : > { %724 = vmatmul.mubr.msk.f32.gmra.mxu0 %vm360_vm2, %v326_v40  ;;  %v343_v62 = vpop.permute.xlu1 %342  ;;  %v491_v9 = vpop.permute.xlu0 %490 }
  0xa7   : > { %726 = vmatprep.mubr.msk.f32.mxu0 %vm868_vm0, %v867_v8 }
  0xaa   : > { %727 = vmatmul.mubr.msk.f32.gmra.mxu0 %vm360_vm2, %v327_v41  ;;  %v486_v10 = vpop.permute.xlu1 %485  ;;  %v501_v15 = vpop.permute.xlu0 %500 }
  0xab   : > { %729 = vmatprep.mubr.msk.f32.mxu0 %vm868_vm0, %v867_v8 }
  0xae   : > { %730 = vmatmul.mubr.msk.f32.gmra.mxu0 %vm360_vm2, %v328_v42  ;;  %v496_v18 = vpop.permute.xlu1 %495 }
  0xaf   : > { %732 = vmatprep.mubr.msk.f32.mxu0 %vm868_vm0, %v867_v8  ;;  %v478_v8 = vld [vmem:[%s1102_s5 + $0x18] sm:$0xff] }
  0xb2   : > { %733 = vmatmul.mubr.msk.f32.gmra.mxu0 %vm360_vm2, %v329_v43 }
 0x162   : > { %v446_v45 = vpop.f32.mrf.mxu0 }
 0x163   : > { %v447_v2 = vadd.f32 %v446_v45, %v338_v1 }
 0x164   : > { %v722_v46 = vpop.f32.mrf.mxu0 }
 0x165   : > { %v470_v5 = vmax.f32 %v447_v2, 0.0 }
 0x166   : > { %v451_v47 = vpop.f32.mrf.mxu0 }
 0x167   : > { %v452_v63 = vadd.f32 %v451_v47, %v343_v62 }
 0x168   : > { %v725_v48 = vpop.f32.mrf.mxu0 }
 0x169   : > { %v471_v4 = vmax.f32 %v452_v63, 0.0 }
 0x16a   : > { %v456_v50 = vpop.f32.mrf.mxu0 }
 0x16b   : > { %v457_v60 = vadd.f32 %v456_v50, %v348_v55 }
 0x16c   : > { %v728_v51 = vpop.f32.mrf.mxu0 }
 0x16d   : > { %v472_v3 = vmax.f32 %v457_v60, 0.0 }
 0x16e   : > { %v461_v52 = vpop.f32.mrf.mxu0 }
 0x16f   : > { %v462_v57 = vadd.f32 %v461_v52, %v353_v53 }
 0x170   : > { %v731_v54 = vpop.f32.mrf.mxu0 }
 0x171   : > { %v473_v0 = vmax.f32 %v462_v57, 0.0 }
 0x172   : > { %v466_v56 = vpop.f32.mrf.mxu0 }
 0x173   : > { %v467_v58 = vadd.f32 %v466_v56, %v358_v49 }
 0x174   : > { %v734_v59 = vpop.f32.mrf.mxu0 }
 0x175   : > { %v474_v61 = vmax.f32 %v467_v58, 0.0 }
 0x177   : > { %735 = vmatprep.subr.mxu1 %v474_v61 }
 0x178   : > { %736 = vmatpush3.msra.mxu1 %v474_v61 }
 0x179   : > { %737 = vmatprep.subr.mxu1 %v473_v0 }
 0x17a   : > { %738 = vmatpush3.msra.mxu1 %v473_v0 }
 0x17b   : > { %739 = vmatprep.subr.mxu1 %v472_v3 }
 0x17c   : > { %740 = vmatpush3.msra.mxu1 %v472_v3 }
 0x17d   : > { %741 = vmatprep.subr.mxu1 %v471_v4 }
 0x17e   : > { %742 = vmatpush3.msra.mxu1 %v471_v4 }
 0x17f   : > { %743 = vmatprep.subr.mxu1 %v470_v5 }
 0x180   : > { %744 = vmatpush3.msra.mxu1 %v470_v5 }
 0x181   : > { %746 = vmatmul.mubr.msk.f32.vlgmr.msra.gmra.mxu1 %vm503_vm3, %v476_v6 }
 0x182   : > { %748 = vmatprep.mubr.msk.f32.mxu1 %vm503_vm3, %v477_v7 }
 0x185   : > { %749 = vmatmul.mubr.msk.f32.gmra.mxu1 %vm503_vm3, %v478_v8 }
 0x241   : > { %v747_v11 = vpop.f32.mrf.mxu1 }
 0x242   : > { %v588_v12 = vadd.f32 %v747_v11, %v491_v9 }
 0x243   : > { %v582_v13 = vpop.f32.mrf.mxu1 }
 0x244   : > { %602 = vst [vmem:[%s269_s22 + $0x8] sm:$0xff] %v588_v12  ;;  %v583_v14 = vadd.f32 %v582_v13, %v486_v10 }
 0x245   : > { %v750_v16 = vpop.f32.mrf.mxu1 }
 0x246   : > { %601 = vst [vmem:[%s269_s22] sm:$0xff] %v583_v14  ;;  %v598_v17 = vadd.f32 %v750_v16, %v501_v15 }
 0x247   : > { %v592_v19 = vpop.f32.mrf.mxu1 }
 0x248   : > { %604 = vst [vmem:[%s269_s22 + $0x18] sm:$0xff] %v598_v17  ;;  %v593_v20 = vadd.f32 %v592_v19, %v496_v18 }
 0x24a   : > { %603 = vst [vmem:[%s269_s22 + $0x10] sm:$0xff] %v593_v20 }
 0x24b   : > { %816 = shalt.err (!%p813_p3)
}
 0x24c   : > { %s817_s18 = scalar_lea.hbm %s1055_s13, 512  ;;  %s821_s21 = scalar_lea.hbm %s1104_s7, 1024 }
 0x24d   : > { %p818_p4 = scmp.ne.s32.totalorder %s1055_s13, %s817_s18  ;;  %p822_p9 = scmp.lt.s32.totalorder %s1055_s13, %s1104_s7 }
 0x24e   : > { %p823_p10 = scmp.lt.s32.totalorder %s821_s21, %s817_s18 }
 0x24f   : > { %p819_p7 = pnand %p818_p4, %p951_p5 }
 0x250   : > { %p824_p11 = por %p823_p10, %p822_p9 }
 0x251   : > { %p820_p8 = pneg %p819_p7 }
 0x253   : > { %p825_p12 = pnand %p824_p11, %p820_p8 }
 0x255   : > { %828 = shalt.err (!%p825_p12)
}
 0x256   : > { %s870_s8 = smov 128   ;;  %s871_s9 = smov 256  }
 0x257   : > { %s872_s14 = smov 8  }
 0x258   : > { %751 = dma.vmem_to_hbm [thread:$0]  (%p951_p5), %s1050_s23, 512, %s1055_s13, %s1057_s28, %s870_s8, %s871_s9, %s872_s14  }
 0x259 PF: > { %p757_p13 = scmp.ge.s32.totalorder %s863_s27, 2  ;;  %s633_s15 = sand.u32 1, %s851_s24  }
 0x25a   : > { %s634_s16 = scalar_lea.sflag [#allocation3], %s633_s15 }
 0x25b   : > { %p754_p0 = pnand %p757_p13, %p955_p6 }
 0x25d   : > { %p755_p1 = pneg %p754_p0 }
 0x25f   : > { %846 = dma.done.wait (%p755_p1), %s634_s16, 512  }
 0x260   : > { %848 = vsyncadd (%p755_p1), %s634_s16, 4294966784  ;;  %p17_p2 = scmp.ge.s32.totalorder %s938_s30, 4   ;;  %s1107_s24 = smov %s855_s25 }
 0x261   : > { %s1108_s25 = smov %s859_s26  ;;  %s1109_s26 = smov %s949_s10 }
 0x262   : > { %s1110_s27 = smov %s938_s30  ;;  %19 = sbr.rel (!%p17_p2) target bundleno = 3 (0x3), region = 83 }
 0x267   :  { %639 = vsyncpa [#allocation3], 1 }
 0x268   :  { %641 = vsyncpa [#allocation3 + $0x1], 1 }

</bundles_post_ra>
